<compile_context>
chip_gen: v5e
topology: v5e:2x2
jax: 0.10.0
libtpu: 0.0.40
codegen_flags: <defaults>
</compile_context>

<pallas_src>
import functools

import jax
import jax.numpy as jnp
from jax import lax
from jax.experimental import pallas as pl
from jax.experimental.pallas import tpu as pltpu

EPS = 1e-5


def _conv3x3_flat(x, w_ref, pad_ref, *, H, W):
    """3x3 'same' conv on a channel-major, spatially flattened activation.

    x:       (C, H*W) float32, lane-dense.
    w_ref:   (Cout, 9*Cin) weight ref, columns ordered (dy, dx, cin).
    pad_ref: (C, H*W + 2*(W+1)) VMEM scratch (flat row padding).
    Returns (Cout, H*W) float32.
    """
    C, HW = x.shape
    P = W + 1
    # Zero only the halo columns; the interior is fully overwritten by x.
    pad_ref[:, :P] = jnp.zeros((C, P), x.dtype)
    pad_ref[:, P + HW:] = jnp.zeros((C, P), x.dtype)
    pad_ref[:, P:P + HW] = x

    # Column-within-row index (computed once), to mask the horizontal wrap of the
    # flattened shift.  Vertical out-of-bounds taps land in the zero halos.
    wcol = lax.broadcasted_iota(jnp.int32, (1, HW), 1) % W

    parts = []
    for dy in range(3):
        for dx in range(3):
            start = dy * W + dx          # == P + (dy-1)*W + (dx-1)
            tap = pad_ref[:, start:start + HW]        # lane-shifted view, no reshape
            if dx == 0:                  # source column w-1 is invalid at w == 0
                tap = jnp.where(wcol >= 1, tap, 0.0)
            elif dx == 2:                # source column w+1 is invalid at w == W-1
                tap = jnp.where(wcol <= W - 2, tap, 0.0)
            parts.append(tap)
    stacked = jnp.concatenate(parts, axis=0)          # (9*C, HW): taps along K
    return jnp.dot(w_ref[...], stacked, preferred_element_type=jnp.float32)


def _conv_stats_kernel(x_ref, w_ref, y_ref, s_ref, q_ref, pad_ref, *, H, W):
    """conv1 + single-sweep BN1 statistics (per-sample sum / sum-of-squares)."""
    y = _conv3x3_flat(x_ref[0], w_ref, pad_ref, H=H, W=W)
    y_ref[0, :, :] = y
    s_ref[0, :, :] = jnp.sum(y, axis=1, keepdims=True)
    q_ref[0, :, :] = jnp.sum(y * y, axis=1, keepdims=True)


def _bn_prelu_conv_stats_kernel(y1_ref, sc_ref, sh_ref, a_ref, w_ref,
                                y2_ref, s_ref, q_ref, pad_ref, *, H, W):
    """BN1 apply (one FMA) + PReLU + conv2 + single-sweep BN2 statistics."""
    z = y1_ref[0] * sc_ref[...] + sh_ref[...]         # fused BN scale/shift
    a = a_ref[0]                                      # PReLU slope from SMEM
    z = jnp.where(z >= 0.0, z, a * z)
    y = _conv3x3_flat(z, w_ref, pad_ref, H=H, W=W)
    y2_ref[0, :, :] = y
    s_ref[0, :, :] = jnp.sum(y, axis=1, keepdims=True)
    q_ref[0, :, :] = jnp.sum(y * y, axis=1, keepdims=True)


def _bn_residual_kernel(x_ref, y2_ref, sc_ref, sh_ref, out_ref):
    """BN2 apply + residual add."""
    out_ref[0, :, :] = x_ref[0] + (y2_ref[0] * sc_ref[...] + sh_ref[...])


def residual_block(x_nchw, params):
    """x_nchw: (N, C, H, W) float32. Returns (N, C, H, W) float32."""
    N, C, H, W = x_nchw.shape
    HW = H * W
    count = float(N * HW)

    x = x_nchw.reshape(N, C, HW).astype(jnp.float32)  # free: no transpose

    def pack_w(w):  # PyTorch (O, I, 3, 3) -> (O, 9*I), columns ordered (dy, dx, cin)
        return jnp.transpose(w, (0, 2, 3, 1)).reshape(C, 9 * C).astype(jnp.float32)

    w1 = pack_w(params["w1"])
    w2 = pack_w(params["w2"])
    # NOTE: conv biases b1/b2 are intentionally NOT passed to the kernels: a
    # per-channel constant added before training-mode BN is exactly cancelled by
    # the mean subtraction (the reference below keeps them and still matches).
    g1 = params["gamma1"].reshape(C, 1).astype(jnp.float32)
    be1 = params["beta1"].reshape(C, 1).astype(jnp.float32)
    g2 = params["gamma2"].reshape(C, 1).astype(jnp.float32)
    be2 = params["beta2"].reshape(C, 1).astype(jnp.float32)
    a = params["prelu_a"].reshape(1).astype(jnp.float32)

    act_spec = pl.BlockSpec((1, C, HW), lambda n: (n, 0, 0))
    w_spec = pl.BlockSpec((C, 9 * C), lambda n: (0, 0))
    vec_spec = pl.BlockSpec((C, 1), lambda n: (0, 0))
    stat_spec = pl.BlockSpec((1, C, 1), lambda n: (n, 0, 0))
    smem_spec = pl.BlockSpec(memory_space=pltpu.MemorySpace.SMEM)
    pad_scratch = pltpu.VMEM((C, HW + 2 * (W + 1)), jnp.float32)
    cparams = pltpu.CompilerParams(dimension_semantics=("parallel",))

    act_shape = jax.ShapeDtypeStruct((N, C, HW), jnp.float32)
    stat_shape = jax.ShapeDtypeStruct((N, C, 1), jnp.float32)

    # ---- pass 1: conv1 + BN1 stats -----------------------------------------
    y1, s1, q1 = pl.pallas_call(
        functools.partial(_conv_stats_kernel, H=H, W=W),
        grid=(N,),
        in_specs=[act_spec, w_spec],
        out_specs=(act_spec, stat_spec, stat_spec),
        out_shape=(act_shape, stat_shape, stat_shape),
        scratch_shapes=[pad_scratch],
        compiler_params=cparams,
    )(x, w1)

    def fold_bn(s, q, gamma, beta):
        # var = E[x^2] - E[x]^2 ; fold gamma*rsqrt into one scale, beta-mean*scale
        # into one shift so normalization is a single FMA inside the next kernel.
        mean = jnp.sum(s, axis=0) / count               # (C, 1)
        var = jnp.sum(q, axis=0) / count - mean * mean  # biased (PyTorch training)
        scale = gamma * lax.rsqrt(var + EPS)
        shift = beta - mean * scale
        return scale, shift

    scale1, shift1 = fold_bn(s1, q1, g1, be1)

    # ---- pass 2: BN1 apply + PReLU + conv2 + BN2 stats ----------------------
    y2, s2, q2 = pl.pallas_call(
        functools.partial(_bn_prelu_conv_stats_kernel, H=H, W=W),
        grid=(N,),
        in_specs=[act_spec, vec_spec, vec_spec, smem_spec, w_spec],
        out_specs=(act_spec, stat_spec, stat_spec),
        out_shape=(act_shape, stat_shape, stat_shape),
        scratch_shapes=[pad_scratch],
        compiler_params=cparams,
    )(y1, scale1, shift1, a, w2)

    scale2, shift2 = fold_bn(s2, q2, g2, be2)

    # ---- pass 3: BN2 apply + residual add -----------------------------------
    out = pl.pallas_call(
        _bn_residual_kernel,
        grid=(N,),
        in_specs=[act_spec, act_spec, vec_spec, vec_spec],
        out_specs=act_spec,
        out_shape=act_shape,
        compiler_params=cparams,
    )(x, y2, scale2, shift2)

    return out.reshape(N, C, H, W)


# ------------------------- pure-JAX reference (faithful, with biases) -------- #
def ref_forward(x_nchw, params):
    def conv(x, w, b):
        y = lax.conv_general_dilated(
            x, w, window_strides=(1, 1), padding="SAME",
            dimension_numbers=("NCHW", "OIHW", "NCHW"))
        return y + b[None, :, None, None]

    def bn(y, g, be):
        mean = jnp.mean(y, axis=(0, 2, 3), keepdims=True)
        var = jnp.mean((y - mean) ** 2, axis=(0, 2, 3), keepdims=True)
        yhat = (y - mean) * lax.rsqrt(var + EPS)
        return yhat * g[None, :, None, None] + be[None, :, None, None]

    r = conv(x_nchw, params["w1"], params["b1"])
    r = bn(r, params["gamma1"], params["beta1"])
    a = params["prelu_a"][0]
    r = jnp.where(r >= 0, r, a * r)
    r = conv(r, params["w2"], params["b2"])
    r = bn(r, params["gamma2"], params["beta2"])
    return x_nchw + r


if __name__ == "__main__":
    N, C, H, W = 2, 4, 16, 16
    key = jax.random.PRNGKey(0)
    kx, k1, k2, k3, k4, k5, k6, k7, k8 = jax.random.split(key, 9)

    x = jax.random.normal(kx, (N, C, H, W), jnp.float32)

    # Deterministic synthetic parameters (shapes from nn.Conv2d/BatchNorm2d/PReLU).
    params = {
        "w1": 0.1 * jax.random.normal(k1, (C, C, 3, 3), jnp.float32),
        "b1": 0.1 * jax.random.normal(k2, (C,), jnp.float32),
        "w2": 0.1 * jax.random.normal(k3, (C, C, 3, 3), jnp.float32),
        "b2": 0.1 * jax.random.normal(k4, (C,), jnp.float32),
        "gamma1": 1.0 + 0.1 * jax.random.normal(k5, (C,), jnp.float32),
        "beta1": 0.1 * jax.random.normal(k6, (C,), jnp.float32),
        "gamma2": 1.0 + 0.1 * jax.random.normal(k7, (C,), jnp.float32),
        "beta2": 0.1 * jax.random.normal(k8, (C,), jnp.float32),
        "prelu_a": jnp.full((1,), 0.25, jnp.float32),  # PReLU default init
    }

    out = residual_block(x, params)
    out = jax.block_until_ready(out)

    ref = ref_forward(x, params)
    max_err = float(jnp.max(jnp.abs(out - ref)))
    assert max_err < 1e-3, f"mismatch vs reference: max_err={max_err}"

    print("KERNEL_OK")
</pallas_src>

<mosaic_0001>
module attributes {stable_mosaic.version = 11 : i64} {
  func.func @_conv_stats_kernel(%arg0: i32, %arg1: memref<1x4x256xf32, #tpu.memory_space<vmem>>, %arg2: memref<4x36xf32, #tpu.memory_space<vmem>>, %arg3: memref<1x4x256xf32, #tpu.memory_space<vmem>>, %arg4: memref<1x4x1xf32, #tpu.memory_space<vmem>>, %arg5: memref<1x4x1xf32, #tpu.memory_space<vmem>>, %arg6: memref<4x290xf32, #tpu.memory_space<vmem>>) attributes {dimension_semantics = [#tpu.dimension_semantics<parallel>], iteration_bounds = array<i64: 2>, scalar_prefetch = 0 : i64, scratch_operands = 1 : i64, tpu.core_type = #tpu.core_type<tc>, window_params = [{transform_indices = @transform_0, window_bounds = array<i64: 1, 4, 256>}, {pipeline_mode = #tpu.pipeline_mode<synchronous>, transform_indices = @transform_1, window_bounds = array<i64: 4, 36>}, {transform_indices = @transform_2, window_bounds = array<i64: 1, 4, 256>}, {transform_indices = @transform_3, window_bounds = array<i64: 1, 4, 1>}, {transform_indices = @transform_4, window_bounds = array<i64: 1, 4, 1>}]} {
    %c0 = arith.constant 0 : index
    %c0_0 = arith.constant 0 : index
    %c0_1 = arith.constant 0 : index
    %0 = vector.load %arg1[%c0, %c0_0, %c0_1] : memref<1x4x256xf32, #tpu.memory_space<vmem>>, vector<1x4x256xf32>
    %1 = vector.shape_cast %0 : vector<1x4x256xf32> to vector<4x256xf32>
    %cst = arith.constant 0.000000e+00 : f32
    %2 = vector.broadcast %cst : f32 to vector<4x17xf32>
    %c0_2 = arith.constant 0 : index
    %c0_3 = arith.constant 0 : index
    %3 = vector.load %arg6[%c0_2, %c0_3] : memref<4x290xf32, #tpu.memory_space<vmem>>, vector<4x17xf32>
    tpu.vector_store %arg6[%c0_2, %c0_3], %2 {strides = array<i32>} : memref<4x290xf32, #tpu.memory_space<vmem>>, vector<4x17xf32>,
    %cst_4 = arith.constant 0.000000e+00 : f32
    %4 = vector.broadcast %cst_4 : f32 to vector<4x17xf32>
    %c0_5 = arith.constant 0 : index
    %c273 = arith.constant 273 : index
    %5 = vector.load %arg6[%c0_5, %c273] : memref<4x290xf32, #tpu.memory_space<vmem>>, vector<4x17xf32>
    tpu.vector_store %arg6[%c0_5, %c273], %4 {strides = array<i32>} : memref<4x290xf32, #tpu.memory_space<vmem>>, vector<4x17xf32>,
    %c0_6 = arith.constant 0 : index
    %c17 = arith.constant 17 : index
    %6 = vector.load %arg6[%c0_6, %c17] : memref<4x290xf32, #tpu.memory_space<vmem>>, vector<4x256xf32>
    tpu.vector_store %arg6[%c0_6, %c17], %1 {strides = array<i32>} : memref<4x290xf32, #tpu.memory_space<vmem>>, vector<4x256xf32>,
    %7 = tpu.iota {dimensions = array<i32: 1>} : vector<1x256xi32>
    %c16_i32 = arith.constant 16 : i32
    %c0_i32 = arith.constant 0 : i32
    %8 = arith.cmpi eq, %c16_i32, %c0_i32 : i32
    %c1_i32 = arith.constant 1 : i32
    %9 = arith.select %8, %c1_i32, %c16_i32 : i32
    %10 = vector.broadcast %9 : i32 to vector<1x256xi32>
    %11 = arith.remsi %7, %10 : vector<1x256xi32>
    %c0_i32_7 = arith.constant 0 : i32
    %12 = vector.broadcast %c0_i32_7 : i32 to vector<1x256xi32>
    %13 = arith.cmpi ne, %11, %12 : vector<1x256xi32>
    %c0_i32_8 = arith.constant 0 : i32
    %14 = vector.broadcast %c0_i32_8 : i32 to vector<1x256xi32>
    %15 = arith.cmpi slt, %11, %14 : vector<1x256xi32>
    %c0_i32_9 = arith.constant 0 : i32
    %16 = arith.cmpi slt, %9, %c0_i32_9 : i32
    %17 = vector.broadcast %16 : i1 to vector<1x256xi1>
    %18 = vector.broadcast %17 : vector<1x256xi1> to vector<1x256xi1>
    %19 = arith.xori %15, %18 : vector<1x256xi1>
    %20 = arith.andi %19, %13 : vector<1x256xi1>
    %21 = vector.broadcast %9 : i32 to vector<1x256xi32>
    %22 = arith.addi %11, %21 : vector<1x256xi32>
    %23 = arith.select %20, %22, %11 : vector<1x256xi1>, vector<1x256xi32>
    %c0_10 = arith.constant 0 : index
    %c0_11 = arith.constant 0 : index
    %24 = vector.load %arg6[%c0_10, %c0_11] : memref<4x290xf32, #tpu.memory_space<vmem>>, vector<4x256xf32>
    %c1_i32_12 = arith.constant 1 : i32
    %25 = vector.broadcast %c1_i32_12 : i32 to vector<1x256xi32>
    %26 = arith.cmpi sge, %23, %25 : vector<1x256xi32>
    %cst_13 = arith.constant 0.000000e+00 : f32
    %27 = vector.shape_cast %26 : vector<1x256xi1> to vector<1x256xi1>
    %28 = vector.broadcast %27 : vector<1x256xi1> to vector<4x256xi1>
    %29 = vector.broadcast %cst_13 : f32 to vector<4x256xf32>
    %30 = arith.select %28, %24, %29 : vector<4x256xi1>, vector<4x256xf32>
    %c0_14 = arith.constant 0 : index
    %c1 = arith.constant 1 : index
    %31 = vector.load %arg6[%c0_14, %c1] : memref<4x290xf32, #tpu.memory_space<vmem>>, vector<4x256xf32>
    %c0_15 = arith.constant 0 : index
    %c2 = arith.constant 2 : index
    %32 = vector.load %arg6[%c0_15, %c2] : memref<4x290xf32, #tpu.memory_space<vmem>>, vector<4x256xf32>
    %c14_i32 = arith.constant 14 : i32
    %33 = vector.broadcast %c14_i32 : i32 to vector<1x256xi32>
    %34 = arith.cmpi sle, %23, %33 : vector<1x256xi32>
    %cst_16 = arith.constant 0.000000e+00 : f32
    %35 = vector.shape_cast %34 : vector<1x256xi1> to vector<1x256xi1>
    %36 = vector.broadcast %35 : vector<1x256xi1> to vector<4x256xi1>
    %37 = vector.broadcast %cst_16 : f32 to vector<4x256xf32>
    %38 = arith.select %36, %32, %37 : vector<4x256xi1>, vector<4x256xf32>
    %c0_17 = arith.constant 0 : index
    %c16 = arith.constant 16 : index
    %39 = vector.load %arg6[%c0_17, %c16] : memref<4x290xf32, #tpu.memory_space<vmem>>, vector<4x256xf32>
    %c1_i32_18 = arith.constant 1 : i32
    %40 = vector.broadcast %c1_i32_18 : i32 to vector<1x256xi32>
    %41 = arith.cmpi sge, %23, %40 : vector<1x256xi32>
    %cst_19 = arith.constant 0.000000e+00 : f32
    %42 = vector.shape_cast %41 : vector<1x256xi1> to vector<1x256xi1>
    %43 = vector.broadcast %42 : vector<1x256xi1> to vector<4x256xi1>
    %44 = vector.broadcast %cst_19 : f32 to vector<4x256xf32>
    %45 = arith.select %43, %39, %44 : vector<4x256xi1>, vector<4x256xf32>
    %c0_20 = arith.constant 0 : index
    %c17_21 = arith.constant 17 : index
    %46 = vector.load %arg6[%c0_20, %c17_21] : memref<4x290xf32, #tpu.memory_space<vmem>>, vector<4x256xf32>
    %c0_22 = arith.constant 0 : index
    %c18 = arith.constant 18 : index
    %47 = vector.load %arg6[%c0_22, %c18] : memref<4x290xf32, #tpu.memory_space<vmem>>, vector<4x256xf32>
    %c14_i32_23 = arith.constant 14 : i32
    %48 = vector.broadcast %c14_i32_23 : i32 to vector<1x256xi32>
    %49 = arith.cmpi sle, %23, %48 : vector<1x256xi32>
    %cst_24 = arith.constant 0.000000e+00 : f32
    %50 = vector.shape_cast %49 : vector<1x256xi1> to vector<1x256xi1>
    %51 = vector.broadcast %50 : vector<1x256xi1> to vector<4x256xi1>
    %52 = vector.broadcast %cst_24 : f32 to vector<4x256xf32>
    %53 = arith.select %51, %47, %52 : vector<4x256xi1>, vector<4x256xf32>
    %c0_25 = arith.constant 0 : index
    %c32 = arith.constant 32 : index
    %54 = vector.load %arg6[%c0_25, %c32] : memref<4x290xf32, #tpu.memory_space<vmem>>, vector<4x256xf32>
    %c1_i32_26 = arith.constant 1 : i32
    %55 = vector.broadcast %c1_i32_26 : i32 to vector<1x256xi32>
    %56 = arith.cmpi sge, %23, %55 : vector<1x256xi32>
    %cst_27 = arith.constant 0.000000e+00 : f32
    %57 = vector.shape_cast %56 : vector<1x256xi1> to vector<1x256xi1>
    %58 = vector.broadcast %57 : vector<1x256xi1> to vector<4x256xi1>
    %59 = vector.broadcast %cst_27 : f32 to vector<4x256xf32>
    %60 = arith.select %58, %54, %59 : vector<4x256xi1>, vector<4x256xf32>
    %c0_28 = arith.constant 0 : index
    %c33 = arith.constant 33 : index
    %61 = vector.load %arg6[%c0_28, %c33] : memref<4x290xf32, #tpu.memory_space<vmem>>, vector<4x256xf32>
    %c0_29 = arith.constant 0 : index
    %c34 = arith.constant 34 : index
    %62 = vector.load %arg6[%c0_29, %c34] : memref<4x290xf32, #tpu.memory_space<vmem>>, vector<4x256xf32>
    %c14_i32_30 = arith.constant 14 : i32
    %63 = vector.broadcast %c14_i32_30 : i32 to vector<1x256xi32>
    %64 = arith.cmpi sle, %23, %63 : vector<1x256xi32>
    %cst_31 = arith.constant 0.000000e+00 : f32
    %65 = vector.shape_cast %64 : vector<1x256xi1> to vector<1x256xi1>
    %66 = vector.broadcast %65 : vector<1x256xi1> to vector<4x256xi1>
    %67 = vector.broadcast %cst_31 : f32 to vector<4x256xf32>
    %68 = arith.select %66, %62, %67 : vector<4x256xi1>, vector<4x256xf32>
    %69 = tpu.concatenate %30, %31, %38, %45, %46, %53, %60, %61, %68 in 0 : vector<4x256xf32>, vector<4x256xf32>, vector<4x256xf32>, vector<4x256xf32>, vector<4x256xf32>, vector<4x256xf32>, vector<4x256xf32>, vector<4x256xf32>, vector<4x256xf32> -> vector<36x256xf32>
    %c0_32 = arith.constant 0 : index
    %c0_33 = arith.constant 0 : index
    %70 = vector.load %arg2[%c0_32, %c0_33] : memref<4x36xf32, #tpu.memory_space<vmem>>, vector<4x36xf32>
    %cst_34 = arith.constant dense<0.000000e+00> : vector<4x256xf32>
    %71 = tpu.matmul %70, %69, %cst_34 {dimension_numbers = #tpu.dot_dimension_numbers<[1], [0], [0], [1], [0, 0, 1, 1], [], []>} : vector<4x36xf32>, vector<36x256xf32>, vector<4x256xf32> -> vector<4x256xf32>
    %c0_35 = arith.constant 0 : index
    %c0_36 = arith.constant 0 : index
    %c0_37 = arith.constant 0 : index
    %72 = vector.load %arg3[%c0_35, %c0_36, %c0_37] : memref<1x4x256xf32, #tpu.memory_space<vmem>>, vector<1x4x256xf32>
    %73 = vector.shape_cast %72 : vector<1x4x256xf32> to vector<4x256xf32>
    %74 = vector.shape_cast %71 : vector<4x256xf32> to vector<1x4x256xf32>
    tpu.vector_store %arg3[%c0_35, %c0_36, %c0_37], %74 {strides = array<i32>} : memref<1x4x256xf32, #tpu.memory_space<vmem>>, vector<1x4x256xf32>,
    %cst_38 = arith.constant dense<0.000000e+00> : vector<4xf32>
    %75 = vector.multi_reduction <add>, %71, %cst_38 [1] : vector<4x256xf32> to vector<4xf32>
    %76 = vector.shape_cast %75 : vector<4xf32> to vector<4x1xf32>
    %c0_39 = arith.constant 0 : index
    %c0_40 = arith.constant 0 : index
    %c0_41 = arith.constant 0 : index
    %77 = vector.load %arg4[%c0_39, %c0_40, %c0_41] : memref<1x4x1xf32, #tpu.memory_space<vmem>>, vector<1x4x1xf32>
    %78 = vector.shape_cast %77 : vector<1x4x1xf32> to vector<4x1xf32>
    %79 = vector.shape_cast %76 : vector<4x1xf32> to vector<1x4x1xf32>
    tpu.vector_store %arg4[%c0_39, %c0_40, %c0_41], %79 {strides = array<i32>} : memref<1x4x1xf32, #tpu.memory_space<vmem>>, vector<1x4x1xf32>,
    %80 = arith.mulf %71, %71 : vector<4x256xf32>
    %cst_42 = arith.constant dense<0.000000e+00> : vector<4xf32>
    %81 = vector.multi_reduction <add>, %80, %cst_42 [1] : vector<4x256xf32> to vector<4xf32>
    %82 = vector.shape_cast %81 : vector<4xf32> to vector<4x1xf32>
    %c0_43 = arith.constant 0 : index
    %c0_44 = arith.constant 0 : index
    %c0_45 = arith.constant 0 : index
    %83 = vector.load %arg5[%c0_43, %c0_44, %c0_45] : memref<1x4x1xf32, #tpu.memory_space<vmem>>, vector<1x4x1xf32>
    %84 = vector.shape_cast %83 : vector<1x4x1xf32> to vector<4x1xf32>
    %85 = vector.shape_cast %82 : vector<4x1xf32> to vector<1x4x1xf32>
    tpu.vector_store %arg5[%c0_43, %c0_44, %c0_45], %85 {strides = array<i32>} : memref<1x4x1xf32, #tpu.memory_space<vmem>>, vector<1x4x1xf32>,
    return
  }
  func.func @transform_0(%arg0: i32) -> (i32, i32, i32) {
    %c0_i32 = arith.constant 0 : i32
    %c0_i32_0 = arith.constant 0 : i32
    %c0_i32_1 = arith.constant 0 : i32
    return %arg0, %c0_i32, %c0_i32_0 : i32, i32, i32
  }
  func.func @transform_1(%arg0: i32) -> (i32, i32) {
    %c0_i32 = arith.constant 0 : i32
    %c0_i32_0 = arith.constant 0 : i32
    %c0_i32_1 = arith.constant 0 : i32
    return %c0_i32, %c0_i32_0 : i32, i32
  }
  func.func @transform_2(%arg0: i32) -> (i32, i32, i32) {
    %c0_i32 = arith.constant 0 : i32
    %c0_i32_0 = arith.constant 0 : i32
    %c0_i32_1 = arith.constant 0 : i32
    return %arg0, %c0_i32, %c0_i32_0 : i32, i32, i32
  }
  func.func @transform_3(%arg0: i32) -> (i32, i32, i32) {
    %c0_i32 = arith.constant 0 : i32
    %c0_i32_0 = arith.constant 0 : i32
    %c0_i32_1 = arith.constant 0 : i32
    return %arg0, %c0_i32, %c0_i32_0 : i32, i32, i32
  }
  func.func @transform_4(%arg0: i32) -> (i32, i32, i32) {
    %c0_i32 = arith.constant 0 : i32
    %c0_i32_0 = arith.constant 0 : i32
    %c0_i32_1 = arith.constant 0 : i32
    return %arg0, %c0_i32, %c0_i32_0 : i32, i32, i32
  }
}

</mosaic_0001>

<bundles_post_ra>
// kernel: tpu_custom_call.1
= control target key start
LH: loop header
LB: loop body
LE: loop exit
PB: predicated region body
PF: predicated region fallthrough
CT: control target
= control target key end

     0   :  { %10 = vsyncpa [#allocation4], 0  ;;  %s1280_s0 = inlined_call_operand.hbm [shape: f32[2,4,256], index: 0, kind: input, shape index: {}]   ;;  %s1281_s1 = inlined_call_operand.hbm [shape: f32[4,36], index: 1, kind: input, shape index: {}]   ;;  %s1282_s2 = inlined_call_operand.hbm [shape: f32[2,4,256], index: 2, kind: output, shape index: {0}]   ;;  %s1283_s3 = inlined_call_operand.vmem [shape: f32[2,4,1], index: 3, kind: output, shape index: {1}]   ;;  %s1284_s4 = inlined_call_operand.vmem [shape: f32[2,4,1], index: 4, kind: output, shape index: {2}]  }
   0x1   :  { %12 = vsyncpa [#allocation4 + $0x1], 0 }
   0x2   :  { %13 = vsyncpa [#allocation7], 0 }
   0x3   :  { %14 = vsyncpa [#allocation5], 0 }
   0x4   :  { %16 = vsyncpa [#allocation5 + $0x1], 0  ;;  %s1032_s15 = smov 0   ;;  %s1034_s16 = smov 0  }
   0x5   :  { %s1036_s17 = smov 0   ;;  %s1038_s18 = smov 0  }
   0x6 LB: > { %s1053_s19 = sadd.s32 4294967295, %s994_s18   ;;  %s738_s20 = sadd.s32 4294967294, %s994_s18   ;;  %s994_s18 = sphi %s1038_s18, %s1302_s18   ;;  %s990_s17 = sphi %s1036_s17, %s1301_s17   ;;  %s986_s16 = sphi %s1034_s16, %s1300_s16   ;;  %s982_s15 = sphi %s1032_s15, %s1299_s15  }
   0x7   : > { %p42_p0 = scmp.ne.s32.totalorder %s986_s16, %s982_s15  ;;  %p43_p1 = scmp.eq.s32.totalorder %s1053_s19, 0 }
   0x8   : > { %p87_p2 = scmp.eq.s32.totalorder %s1053_s19, 1  ;;  %p93_p3 = scmp.eq.s32.totalorder %s738_s20, 1 }
   0x9   : > { %p1062_p4 = por %p43_p1, %p42_p0  ;;  %p739_p5 = scmp.ge.s32.totalorder %s994_s18, 1 }
   0xa   : > { %p1067_p6 = por %p93_p3, %p42_p0  ;;  %p152_p7 = scmp.lt.s32.totalorder %s994_s18, 3 }
   0xb   : > { %s164_s25 = sshll.u32 %s1281_s1, 4  ;;  %s996_s27 = smov [#allocation6]   ;;  %s165_s25 = int_to_ptr.hbm [resolvable:$true] %s164_s25 }
   0xc   : > { %p1075_p8 = pnand %p739_p5, %p152_p7  ;;  %s166_s28 = sshll.u32 %s996_s27, 4  ;;  %s167_s28 = int_to_ptr.vmem [resolvable:$true] %s166_s28 }
   0xd   : > { %s1085_s29 = sadd.s32 1, %s994_s18   ;;  %s29_s30 = sadd.s32 1, %s990_s17 }
   0xe   : > { %p770_p10 = pneg %p1075_p8  ;;  %s26_s5 = ssub.s32 %s994_s18, %s1085_s29 }
   0xf   : > { %p27_p12 = scmp.eq.s32.totalorder %s26_s5, 0  ;;  %p36_p13 = scmp.ne.s32.totalorder %s990_s17, %s986_s16 }
  0x10   : > { %p771_p11 = pnand %p770_p10, %p43_p1  ;;  %p37_p0 = scmp.eq.s32.totalorder %s994_s18, 0 }
  0x11   : > { %s1094_s6 = scalar_select %p27_p12, %s990_s17, %s29_s30  }
  0x12   : > { %773 = dma.hbm_to_vmem [thread:$0]  (!%p771_p11), %s165_s25, 64, %s167_s28, [#allocation7]  }
  0x13   : > { %p1098_p3 = por %p87_p2, %p36_p13  ;;  %p783_p5 = scmp.lt.s32.totalorder %s994_s18, 2 }
  0x14   : > { %s177_s8 = sand.u32 1, %s990_s17   ;;  %s760_s9 = sshll.u32 %s994_s18, 3 }
  0x15   : > { %p38_p7 = por %p37_p0, %p36_p13  ;;  %s742_s10 = sshll.u32 %s177_s8, 3 }
  0x16   : > { %s186_s13 = scalar_lea.hbm %s1280_s0, %s760_s9  ;;  %s181_s20 = scalar_lea.vmem [#allocation3], %s742_s10 }
  0x17   : > { %s188_s14 = sshll.u32 %s186_s13, 4  ;;  %s190_s23 = sshll.u32 %s181_s20, 4  ;;  %s189_s14 = int_to_ptr.hbm [resolvable:$true] %s188_s14  ;;  %s191_s23 = int_to_ptr.vmem [resolvable:$true] %s190_s23 }
  0x18   : > { %p1108_p10 = pnand %p783_p5, %p38_p7  ;;  %s178_s25 = scalar_lea.sflag [#allocation4], %s177_s8 }
  0x19   : > { %s894_s27 = sshra.s32 %s189_s14, 4  ;;  %s901_s9 = scalar_lea.hbm %s1280_s0, 16  ;;  %s895_s27 = int_to_ptr.hbm [resolvable:$true] %s894_s27 }
  0x1a   : > { %s896_s28 = scalar_lea.hbm %s895_s27, 8  ;;  %p898_p11 = pneg %p1108_p10 }
  0x1b   : > { %p897_p2 = scmp.ne.s32.totalorder %s895_s27, %s896_s28  ;;  %p902_p0 = scmp.lt.s32.totalorder %s895_s27, %s1280_s0 }
  0x1c   : > { %p903_p5 = scmp.lt.s32.totalorder %s901_s9, %s896_s28 }
  0x1d   : > { %p899_p12 = pnand %p898_p11, %p897_p2 }
  0x1e   : > { %p904_p7 = por %p903_p5, %p902_p0 }
  0x1f   : > { %p900_p13 = pneg %p899_p12 }
  0x21   : > { %p905_p9 = pnand %p904_p7, %p900_p13 }
  0x23   : > { %908 = shalt.err (!%p905_p9)
}
  0x24   : > { %777 = dma.hbm_to_vmem [thread:$0]  (!%p1108_p10), %s189_s14, 128, %s191_s23, %s178_s25  }
  0x25   : > { %199 = sbr.rel (%p1075_p8) target bundleno = 623 (0x26f), region = 28  ;;  %s1125_s8 = sand.u32 (!%p1075_p8), 1, %s986_s16  }
  0x26   : > { %s746_s12 = sshll.u32 (!%p1075_p8), %s1125_s8, 3  ;;  %s202_s13 = scalar_lea.sflag (!%p1075_p8), [#allocation4], %s1125_s8 }
  0x27   : > { %s205_s20 = scalar_lea.vmem (!%p1075_p8), [#allocation3], %s746_s12 }
  0x2a   : > { %969 = dma.done.wait (%p1062_p4), %s202_s13, 128  }
  0x2b   : > { %971 = vsyncadd (%p1062_p4), %s202_s13, 4294967168 }
  0x2c   : > { %973 = dma.done.wait (%p43_p1), [#allocation7], 64  }
  0x2d   : > { %975 = vsyncadd (%p43_p1), [#allocation7], 4294967232  ;;  %vm253_vm0 = vcmask 134144   ;;  %vm255_vm1 = vcmask 273544   ;;  %v997_v0 = vmov 0.0   ;;  %v252_v1 = vld [vmem:[%s205_s20] sm:$0xff]  ;;  %v270_v49 = vlaneseq }
  0x2e   : > { %254 = vst.msk [vmem:[#allocation2] sm:$0xf] %vm253_vm0, %v997_v0  ;;  %s998_s26 = smov 17   ;;  %vm265_vm2 = vcmask 1043592   ;;  %vm266_vm3 = vcmask 1047556   ;;  %vm261_vm4 = vcmask 138240  }
  0x2f   : > { %256 = vst.msk [vmem:[#allocation2 + $0x8] sm:$0xf] %vm255_vm1, %v997_v0  ;;  %258 = vrot.lane.b32.xlu0 %v252_v1, %s998_s26  ;;  %vm267_vm5 = vmor %vm266_vm3, %vm265_vm2  ;;  %s999_s21 = smov 112   ;;  %s1000_s14 = smov 126   ;;  %v271_v50 = vand.u32 127, %v270_v49  ;;  %vm426_vm6 = vcmask 769024  }
  0x30   : > { %s1001_s23 = smov 110   ;;  %s1002_s24 = smov 96   ;;  %vm403_vm7 = vcmask 785408   ;;  %vm498_vm9 = vcmask 1043456   ;;  %vm493_vm11 = vcmask 777216   ;;  %vm380_vm14 = vcmask 900096  }
  0x31   : > { %s1003_s25 = smov 94   ;;  %s1004_s27 = smov 111   ;;  %v272_v54 = vadd.s32 128, %v271_v50  ;;  %v277_v57 = vand.u32 15, %v271_v50  ;;  %vm357_vm15 = vcmask 916480   ;;  %vm469_vm1 = vcmask 908288  }
  0x32   : > { %s1005_s28 = smov 95   ;;  %s1006_s30 = smov 127   ;;  %vm446_vm2 = vcmask 1039360   ;;  %vm508_vm3 = vcmask 293888  }
  0x33   : > { %v284_v58 = vand.u32 15, %v272_v54  ;;  %vm1165_vm8 = vcmp.le.s32.totalorder %v277_v57, 14  ;;  %vm1180_vm12 = vcmp.ge.s32.totalorder %v277_v57, 1  ;;  %s761_s5 = sshll.u32 %s1053_s19, 3  ;;  %s231_s13 = scalar_lea.vmem [#allocation8], %s746_s12 }
  0x34   : > { %s599_s11 = scalar_lea.hbm %s1282_s2, %s761_s5  ;;  %s601_s20 = sshll.u32 %s231_s13, 4  ;;  %s602_s20 = int_to_ptr.vmem [resolvable:$true] %s601_s20 }
  0x35   : > { %vm1169_vm10 = vcmp.le.s32.totalorder %v284_v58, 14  ;;  %vm1189_vm13 = vcmp.ge.s32.totalorder %v284_v58, 1  ;;  %s603_s26 = sshll.u32 %s599_s11, 4  ;;  %s580_s12 = scalar_lea.sflag [#allocation5], %s1125_s8  ;;  %s604_s26 = int_to_ptr.hbm [resolvable:$true] %s603_s26 }
  0xa1   : > { %v259_v2 = vpop.permute.xlu0 %258 }
  0xa2   : > { %v260_v3 = vrot.slane %v259_v2, 4 }
  0xa4   : > { %v262_v4 = vsel %vm261_vm4, %v260_v3, %v259_v2  ;;  %269 = vst.msk [vmem:[#allocation2 + $0x8] sm:$0xf] %vm253_vm0, %v260_v3  ;;  %vm334_vm0 = vcmask 1031168  }
  0xa5   : > { %268 = vst.msk [vmem:[#allocation2] sm:$0xff] %vm267_vm5, %v262_v4 }
  0xab   : > { %v313_v5 = vld [vmem:[#allocation2 + $0x8] sm:$0xf] }
  0xac   : > { %v1139_v6 = vld [vmem:[#allocation2] sm:$0xff]  ;;  %324 = vst [vmem:[#allocation1 + $0x10] ss:$2 sm:$0xff] %v313_v5  ;;  %v342_v10 = vld [vmem:[#allocation2 + $0x8] sm:$0xf] }
  0xad   : > { %305 = vst [vmem:[#allocation1] ss:$2 sm:$0xff] %v1139_v6  ;;  %v365_v11 = vld [vmem:[#allocation2 + $0x8] sm:$0xf] }
  0xae   : > { %v388_v15 = vld [vmem:[#allocation2 + $0x8] sm:$0xf] }
  0xaf   : > { %v411_v21 = vld [vmem:[#allocation2 + $0x8] sm:$0xf] }
  0xb3   : > { %v1142_v7 = vld.sshfl [vmem:[#allocation1 + $0x10] sm:$0xff pattern:$0x75316420] }
  0xb4   : > { %v1144_v8 = vld.sshfl [vmem:[#allocation1] sm:$0xff pattern:$0x75316420]  ;;  %v1146_v9 = vld.sshfl [vmem:[#allocation1 + $0x8] sm:$0xff pattern:$0x75316420] }
  0xb5   : > { %322 = vst [vmem:[#allocation1] ss:$2 sm:$0xff] %v1139_v6 }
  0xb6   : > { %347 = vst [vmem:[#allocation1 + $0x10] ss:$2 sm:$0xff] %v342_v10 }
  0xbc   : > { %v325_v12 = vld.sshfl [vmem:[#allocation1] sm:$0xff pattern:$0x75316420]  ;;  %v326_v13 = vld.sshfl [vmem:[#allocation1 + $0x8] sm:$0xff pattern:$0x75316420] }
  0xbd   : > { %v350_v14 = vld.sshfl [vmem:[#allocation1 + $0x10] sm:$0xff pattern:$0x75316420]  ;;  %345 = vst [vmem:[#allocation1] ss:$2 sm:$0xff] %v1139_v6  ;;  %v829_v16 = vpack.i.bf16 %v326_v13, %v325_v12 }
  0xbe   : > { %355 = vrot.lane.b32.xlu2 %v350_v14, %s999_s21  ;;  %370 = vst [vmem:[#allocation1 + $0x10] ss:$2 sm:$0xff] %v365_v11 }
  0xc4   : > { %v348_v17 = vld.sshfl [vmem:[#allocation1] sm:$0xff pattern:$0x75316420]  ;;  %v349_v18 = vld.sshfl [vmem:[#allocation1 + $0x8] sm:$0xff pattern:$0x75316420] }
  0xc5   : > { %v834_v19 = vpack.i.bf16 %v349_v18, %v348_v17  ;;  %368 = vst [vmem:[#allocation1] ss:$2 sm:$0xff] %v1139_v6  ;;  %v373_v20 = vld.sshfl [vmem:[#allocation1 + $0x10] sm:$0xff pattern:$0x75316420] }
  0xc6   : > { %830 = vrot.lane.b32.xlu2 %v829_v16, %s1000_s14  ;;  %393 = vst [vmem:[#allocation1 + $0x10] ss:$2 sm:$0xff] %v388_v15 }
  0xc7   : > { %835 = vrot.lane.b32.xlu1 %v834_v19, %s999_s21  ;;  %s938_s21 = sshra.s32 %s604_s26, 4  ;;  %s939_s21 = int_to_ptr.hbm [resolvable:$true] %s938_s21 }
  0xc8   : > { %p945_p9 = scmp.lt.s32.totalorder %s939_s21, %s1282_s2 }
  0xcc   : > { %v371_v22 = vld.sshfl [vmem:[#allocation1] sm:$0xff pattern:$0x75316420]  ;;  %v372_v23 = vld.sshfl [vmem:[#allocation1 + $0x8] sm:$0xff pattern:$0x75316420] }
  0xcd   : > { %v396_v24 = vld.sshfl [vmem:[#allocation1 + $0x10] sm:$0xff pattern:$0x75316420]  ;;  %391 = vst [vmem:[#allocation1] ss:$2 sm:$0xff] %v1139_v6  ;;  %v839_v25 = vpack.i.bf16 %v372_v23, %v371_v22 }
  0xce   : > { %378 = vrot.lane.b32.xlu2 %v373_v20, %s1001_s23  ;;  %416 = vst [vmem:[#allocation1 + $0x10] ss:$2 sm:$0xff] %v411_v21 }
  0xcf   : > { %401 = vrot.lane.b32.xlu1 %v396_v24, %s1002_s24 }
  0xd4   : > { %v394_v26 = vld.sshfl [vmem:[#allocation1] sm:$0xff pattern:$0x75316420]  ;;  %v395_v27 = vld.sshfl [vmem:[#allocation1 + $0x8] sm:$0xff pattern:$0x75316420] }
  0xd5   : > { %v419_v28 = vld.sshfl [vmem:[#allocation1 + $0x10] sm:$0xff pattern:$0x75316420]  ;;  %v844_v29 = vpack.i.bf16 %v395_v27, %v394_v26  ;;  %414 = vst [vmem:[#allocation1] ss:$2 sm:$0xff] %v1139_v6 }
  0xd6   : > { %840 = vrot.lane.b32.xlu2 %v839_v25, %s1001_s23  ;;  %436 = vst [vmem:[#allocation1 + $0x11] ss:$2 sm:$0xff] %v313_v5 }
  0xd7   : > { %424 = vrot.lane.b32.xlu1 %v419_v28, %s1003_s25  ;;  %845 = vrot.lane.b32.xlu0 %v844_v29, %s1002_s24 }
  0xdc   : > { %v418_v30 = vld.sshfl [vmem:[#allocation1 + $0x8] sm:$0xff pattern:$0x75316420]  ;;  %v417_v31 = vld.sshfl [vmem:[#allocation1] sm:$0xff pattern:$0x75316420] }
  0xdd   : > { %v439_v32 = vld.sshfl [vmem:[#allocation1 + $0x10] sm:$0xff pattern:$0x75316420]  ;;  %434 = vst [vmem:[#allocation1 + $0x1] ss:$2 sm:$0xff] %v1139_v6 }
  0xde   : > { %459 = vst [vmem:[#allocation1 + $0x10] ss:$2 sm:$0xff] %v365_v11 }
  0xdf   : > { %422 = vrot.lane.b32.xlu1 %v418_v30, %s1003_s25  ;;  %420 = vrot.lane.b32.xlu0 %v417_v31, %s1003_s25  ;;  %s944_s25 = scalar_lea.hbm %s1282_s2, 16 }
  0xe4   : > { %v437_v33 = vld.sshfl [vmem:[#allocation1] sm:$0xff pattern:$0x75316420]  ;;  %v438_v34 = vld.sshfl [vmem:[#allocation1 + $0x8] sm:$0xff pattern:$0x75316420] }
  0xe5   : > { %v462_v35 = vld.sshfl [vmem:[#allocation1 + $0x10] sm:$0xff pattern:$0x75316420]  ;;  %457 = vst [vmem:[#allocation1] ss:$2 sm:$0xff] %v1139_v6  ;;  %v854_v39 = vpack.i.bf16 %v438_v34, %v437_v33 }
  0xe6   : > { %483 = vst [vmem:[#allocation1 + $0x11] ss:$2 sm:$0xff] %v411_v21 }
  0xe7   : > { %467 = vrot.lane.b32.xlu1 %v462_v35, %s1004_s27 }
  0xec   : > { %v460_v36 = vld.sshfl [vmem:[#allocation1] sm:$0xff pattern:$0x75316420]  ;;  %v461_v37 = vld.sshfl [vmem:[#allocation1 + $0x8] sm:$0xff pattern:$0x75316420] }
  0xed   : > { %v486_v38 = vld.sshfl [vmem:[#allocation1 + $0x10] sm:$0xff pattern:$0x75316420]  ;;  %481 = vst [vmem:[#allocation1 + $0x1] ss:$2 sm:$0xff] %v1139_v6  ;;  %v849_v40 = vpack.i.bf16 %v461_v37, %v460_v36 }
  0xee   : > { %491 = vrot.lane.b32.xlu0 %v486_v38, %s1005_s28 }
  0xef   : > { %855 = vrot.lane.b32.xlu1 %v854_v39, %s1006_s30 }
  0xf4   : > { %v484_v41 = vld.sshfl [vmem:[#allocation1] sm:$0xff pattern:$0x75316420]  ;;  %v485_v42 = vld.sshfl [vmem:[#allocation1 + $0x8] sm:$0xff pattern:$0x75316420] }
  0xf5   : > { %v859_v43 = vpack.i.bf16 %v485_v42, %v484_v41 }
  0xf6   : > { %850 = vrot.lane.b32.xlu0 %v849_v40, %s1004_s27 }
  0xf7   : > { %860 = vrot.lane.b32.xlu2 %v859_v43, %s1005_s28 }
  0xfe   : > { %332 = vrot.lane.b32.xlu0 %v1142_v7, %s1000_s14  ;;  %s940_s14 = scalar_lea.hbm %s939_s21, 8 }
  0xff   : > { %444 = vrot.lane.b32.xlu2 %v439_v32, %s1006_s30  ;;  %p941_p1 = scmp.ne.s32.totalorder %s939_s21, %s940_s14  ;;  %p946_p10 = scmp.lt.s32.totalorder %s944_s25, %s940_s14 }
 0x101   : > { %p942_p4 = pnand %p941_p1, %p1098_p3  ;;  %p947_p2 = por %p946_p10, %p945_p9 }
 0x103   : > { %p943_p8 = pneg %p942_p4 }
 0x105   : > { %p948_p11 = pnand %p947_p2, %p943_p8 }
 0x118   : > { %v1159_v44 = vpop.permute.xlu2 %355 }
 0x120   : > { %v1161_v45 = vpop.permute.xlu2 %830 }
 0x121   : > { %v833_v24 = vunpack.i.h.bf16 %v1161_v45  ;;  %v832_v25 = vunpack.i.l.bf16 %v1161_v45 }
 0x123   : > { %v335_v34 = vsel %vm334_vm0, %v832_v25, %v833_v24 }
 0x128   : > { %v379_v47 = vpop.permute.xlu2 %378 }
 0x130   : > { %v841_v53 = vpop.permute.xlu2 %840 }
 0x131   : > { %v843_v16 = vunpack.i.h.bf16 %v841_v53  ;;  %v842_v17 = vunpack.i.l.bf16 %v841_v53 }
 0x133   : > { %v381_v26 = vsel %vm380_vm14, %v842_v17, %v843_v16  ;;  %v382_v27 = vsel %vm380_vm14, %v843_v16, %v379_v47 }
 0x134   : > { %v385_v30 = vsel %vm1165_vm8, %v381_v26, 0.0  ;;  %v386_v31 = vsel %vm1169_vm10, %v382_v27, 0.0 }
 0x135   : > { %v476_v39 = vrot.slane %v385_v30, 4  ;;  %v477_v40 = vrot.slane %v386_v31, 4 }
 0x139   : > { %v1163_v46 = vpop.permute.xlu1 %835 }
 0x13a   : > { %v838_v18 = vunpack.i.h.bf16 %v1163_v46  ;;  %v837_v19 = vunpack.i.l.bf16 %v1163_v46 }
 0x13c   : > { %v358_v28 = vsel %vm357_vm15, %v837_v19, %v838_v18  ;;  %v359_v45 = vsel %vm357_vm15, %v838_v18, %v1159_v44  ;;  %v310_v44 = vsel %vm1180_vm12, %v1144_v8, 0.0 }
 0x13d   : > { %v362_v32 = vsel %vm1180_vm12, %v358_v28, 0.0 }
 0x13e   : > { %v453_v41 = vrot.slane %v362_v32, 4 }
 0x141   : > { %v402_v48 = vpop.permute.xlu1 %401 }
 0x149   : > { %v425_v51 = vpop.permute.xlu1 %424  ;;  %v846_v52 = vpop.permute.xlu0 %845 }
 0x14a   : > { %v848_v55 = vunpack.i.h.bf16 %v846_v52  ;;  %v847_v56 = vunpack.i.l.bf16 %v846_v52  ;;  %v507_v52 = vld [vmem:[#allocation6] sm:$0xf] }
 0x14c   : > { %v404_v2 = vsel %vm403_vm7, %v847_v56, %v848_v55  ;;  %v405_v14 = vsel %vm403_vm7, %v848_v55, %v402_v48  ;;  %v339_v48 = vsel %vm1165_vm8, %v335_v34, 0.0 }
 0x14d   : > { %v408_v10 = vsel %vm1180_vm12, %v404_v2, 0.0  ;;  %v409_v22 = vsel %vm1189_vm13, %v405_v14, 0.0  ;;  %v501_v50 = vsel %vm498_vm9, %v339_v48, %v453_v41 }
 0x151   : > { %v423_v59 = vpop.permute.xlu1 %422  ;;  %v421_v60 = vpop.permute.xlu0 %420 }
 0x152   : > { %v861_v63 = vpop.permute.xlu2 %860  ;;  %v427_v0 = vsel %vm426_vm6, %v421_v60, %v423_v59  ;;  %v428_v1 = vsel %vm426_vm6, %v423_v59, %v425_v51  ;;  %v363_v51 = vsel %vm1189_vm13, %v359_v45, 0.0  ;;  %v311_v60 = vsel %vm1189_vm13, %v1146_v9, 0.0 }
 0x153   : > { %v863_v3 = vunpack.i.h.bf16 %v861_v63  ;;  %v862_v4 = vunpack.i.l.bf16 %v861_v63  ;;  %v431_v5 = vsel %vm1165_vm8, %v427_v0, 0.0  ;;  %v432_v6 = vsel %vm1169_vm10, %v428_v1, 0.0 }
 0x154   : > { %751 = vmatpush.msk.msra.mxu0 %vm498_vm9, %v431_v5  ;;  %753 = vmatpush.msk.msra.mxu1 %vm498_vm9, %v432_v6  ;;  %v454_v57 = vrot.slane %v363_v51, 4 }
 0x155   : > { %v494_v11 = vsel %vm493_vm11, %v862_v4, %v863_v3 }
 0x156   : > { %v505_v12 = vsel %vm498_vm9, %v408_v10, %v494_v11 }
 0x157   : > { %530 = vmatpush.msra.mxu0 %v505_v12 }
 0x159   : > { %v468_v13 = vpop.permute.xlu1 %467 }
 0x15a   : > { %v445_v55 = vpop.permute.xlu2 %444 }
 0x160   : > { %v492_v20 = vpop.permute.xlu0 %491 }
 0x161   : > { %v495_v21 = vsel %vm493_vm11, %v863_v3, %v492_v20  ;;  %v856_v29 = vpop.permute.xlu1 %855 }
 0x162   : > { %v506_v23 = vsel %vm498_vm9, %v409_v22, %v495_v21  ;;  %v858_v35 = vunpack.i.h.bf16 %v856_v29  ;;  %v857_v36 = vunpack.i.l.bf16 %v856_v29 }
 0x163   : > { %550 = vmatpush.msra.mxu1 %v506_v23 }
 0x164   : > { %v447_v49 = vsel %vm446_vm2, %v857_v36, %v858_v35  ;;  %v448_v59 = vsel %vm446_vm2, %v858_v35, %v445_v55 }
 0x165   : > { %v499_v54 = vsel %vm498_vm9, %v310_v44, %v447_v49  ;;  %v500_v61 = vsel %vm498_vm9, %v311_v60, %v448_v59 }
 0x168   : > { %v851_v33 = vpop.permute.xlu0 %850 }
 0x169   : > { %v853_v37 = vunpack.i.h.bf16 %v851_v33  ;;  %v852_v38 = vunpack.i.l.bf16 %v851_v33 }
 0x16b   : > { %v470_v42 = vsel %vm469_vm1, %v852_v38, %v853_v37  ;;  %v471_v43 = vsel %vm469_vm1, %v853_v37, %v468_v13 }
 0x16c   : > { %v503_v46 = vsel %vm498_vm9, %v470_v42, %v476_v39  ;;  %v504_v47 = vsel %vm498_vm9, %v471_v43, %v477_v40 }
 0x16d   : > { %531 = vmatpush.msra.mxu0 %v503_v46  ;;  %551 = vmatpush.msra.mxu1 %v504_v47 }
 0x16f   : > { %532 = vmatpush.msra.mxu0 %v501_v50 }
 0x170   : > { %v333_v53 = vpop.permute.xlu0 %332 }
 0x171   : > { %v336_v56 = vsel %vm334_vm0, %v833_v24, %v333_v53  ;;  %533 = vmatpush.msra.mxu0 %v499_v54 }
 0x172   : > { %v340_v58 = vsel %vm1169_vm10, %v336_v56, 0.0  ;;  %752 = vmatmul.msk.f32.vlgmr.msra.gmra.mxu0 %vm508_vm3, %v507_v52 }
 0x173   : > { %v502_v8 = vsel %vm498_vm9, %v340_v58, %v454_v57 }
 0x174   : > { %552 = vmatpush.msra.mxu1 %v502_v8 }
 0x176   : > { %553 = vmatpush.msra.mxu1 %v500_v61 }
 0x177   : > { %754 = vmatmul.msk.f32.vlgmr.msra.gmra.mxu1 %vm508_vm3, %v507_v52 }
 0x1ef   : > { %v535_v63 = vpop.f32.mrf.mxu0 }
 0x1f0   : > { %v571_v62 = vmul.f32 %v535_v63, %v535_v63  ;;  %v564_v0 = vsel %vm498_vm9, %v535_v63, 0.0 }
 0x1f2   : > { %v573_v4 = vsel %vm498_vm9, %v571_v62, 0.0 }
 0x1f4   : > { %v555_v1 = vpop.f32.mrf.mxu1 }
 0x1f5   : > { %v560_v9 = vrot.slane %v555_v1, 4  ;;  %v565_v2 = vsel %vm498_vm9, %v555_v1, 0.0  ;;  %v572_v3 = vmul.f32 %v555_v1, %v555_v1 }
 0x1f6   : > { %v566_v5 = vadd.f32 %v565_v2, %v564_v0 }
 0x1f7   : > { %v561_v6 = vsel %vm498_vm9, %v535_v63, %v560_v9  ;;  %v574_v7 = vsel %vm498_vm9, %v572_v3, 0.0 }
 0x1f8   : > { %567 = vadd.xlane.f32.xlu0 %v566_v5  ;;  %v575_v10 = vadd.f32 %v574_v7, %v573_v4  ;;  %563 = vst [vmem:[%s231_s13] sm:$0xff] %v561_v6 }
 0x1f9   : > { %951 = shalt.err (!%p948_p11)
}
 0x1fa   : > { %768 = dma.vmem_to_hbm [thread:$0]  (%p1098_p3), %s602_s20, 128, %s604_s26, %s580_s12   ;;  %576 = vadd.xlane.f32.xlu1 %v575_v10  ;;  %vm569_vm4 = vcmask 3072  }
 0x1fb   : > { %p244_p12 = scmp.lt.s32.totalorder %s1053_s19, 1 }
 0x1fd   : > { %s1304_s19 = smov (!%p244_p12, %s1053_s19), 1 }
 0x1fe   : > { %s749_s8 = sshll.u32 %s1304_s19, 2 }
 0x1ff   : > { %s247_s9 = scalar_lea.vmem %s1283_s3, %s749_s8  ;;  %s251_s13 = scalar_lea.vmem %s1284_s4, %s749_s8 }
 0x26b   : > { %v568_v11 = vpop.xlane.xlu0 %567 }
 0x26c   : > { %570 = vst.msk [vmem:[%s247_s9] sm:$0xf] %vm569_vm4, %v568_v11 }
 0x26d   : > { %v577_v12 = vpop.xlane.xlu1 %576 }
 0x26e   : > { %578 = vst.msk [vmem:[%s251_s13] sm:$0xf] %vm569_vm4, %v577_v12 }
 0x26f PF: > { %s621_s7 = sand.u32 1, %s982_s15   ;;  %p1298_p3 = scmp.ge.s32.totalorder %s994_s18, 2 }
 0x270   : > { %s622_s19 = scalar_lea.sflag [#allocation5], %s621_s7 }
 0x271   : > { %p779_p13 = pnand %p1298_p3, %p1067_p6 }
 0x273   : > { %p780_p0 = pneg %p779_p13 }
 0x275   : > { %977 = dma.done.wait (%p780_p0), %s622_s19, 128  }
 0x276   : > { %979 = vsyncadd (%p780_p0), %s622_s19, 4294967168  ;;  %p19_p5 = scmp.ge.s32.totalorder %s1085_s29, 4   ;;  %s1299_s15 = smov %s986_s16 }
 0x277   : > { %s1300_s16 = smov %s990_s17  ;;  %s1301_s17 = smov %s1094_s6 }
 0x278   : > { %s1302_s18 = smov %s1085_s29  ;;  %21 = sbr.rel (!%p19_p5) target bundleno = 6 (0x6), region = 111 }
 0x27d   :  { %642 = vsyncpa [#allocation4], 1 }
 0x27e   :  { %644 = vsyncpa [#allocation4 + $0x1], 1 }
 0x27f   :  { %645 = vsyncpa [#allocation7], 1 }
 0x280   :  { %646 = vsyncpa [#allocation5], 1 }
 0x281   :  { %648 = vsyncpa [#allocation5 + $0x1], 1 }

</bundles_post_ra>
